<compile_context>
chip_gen: v7x
topology: tpu7x:2x2x1
jax: 0.10.0
libtpu: 0.0.40
codegen_flags: <defaults>
</compile_context>

<pallas_src>
import functools

import jax
import jax.numpy as jnp
from jax.experimental import pallas as pl
from jax.experimental.pallas import tpu as pltpu


def _round_up(x, m):
    return ((x + m - 1) // m) * m


def _layernorm_kernel(x_ref, g_ref, b_ref, o_ref, *, eps, d_true):
    # x_ref: (TM, Dp); g_ref/b_ref: (1, Dp), already float32.
    # Padded lanes (>= d_true) hold zeros in x and in gamma/beta, so they add
    # nothing to the statistics and produce zeros in the (discarded) padded output.
    x = x_ref[...].astype(jnp.float32)
    inv_d = jnp.float32(1.0 / d_true)
    s = jnp.sum(x, axis=-1, keepdims=True)
    sq = jnp.sum(x * x, axis=-1, keepdims=True)
    mean = s * inv_d
    var = jnp.maximum(sq * inv_d - mean * mean, 0.0)  # biased variance (unbiased=False)
    inv = jax.lax.rsqrt(var + eps)                    # EUP transcendental, ~free slot
    y = (x - mean) * inv
    o_ref[...] = (g_ref[...] * y + b_ref[...]).astype(o_ref.dtype)


def layer_norm(x, gamma, beta, eps=1e-12, tile_rows=None):
    """x: (..., d_model); gamma/beta: (d_model,). Matches torch LayerNorm module above."""
    orig_shape = x.shape
    d_model = orig_shape[-1]
    x2 = x.reshape(-1, d_model)
    rows = x2.shape[0]
    dtype = x.dtype
    itemsize = jnp.dtype(dtype).itemsize

    # Lane-dense last dim: pad to a multiple of 128.
    d_pad = _round_up(d_model, 128)
    # Sublane alignment for the row tile: 8 (f32), 16 (bf16), 32 (int8/fp8).
    sublane = max(8, 32 // itemsize)

    if tile_rows is None:
        # ~2 MiB per input tile: big enough to sit near the HBM roofline, small
        # enough that double-buffered (in + out) fits every generation's scoped
        # VMEM with plenty of headroom.
        target_tile_bytes = 2 << 20
        tile_rows = target_tile_bytes // (itemsize * d_pad)
    tile_rows = int(min(tile_rows, _round_up(rows, sublane)))
    tile_rows = max(sublane, (tile_rows // sublane) * sublane)

    rows_pad = _round_up(rows, tile_rows)
    grid = rows_pad // tile_rows

    # Wrapper-side zero padding; padded rows/lanes are inert and sliced off below.
    padded = (rows_pad != rows) or (d_pad != d_model)
    if padded:
        x2 = jnp.pad(x2, ((0, rows_pad - rows), (0, d_pad - d_model)))

    # gamma/beta: cast to f32 once here (no per-step cast in the kernel),
    # zero in the padded lanes.
    g2 = jnp.zeros((1, d_pad), jnp.float32).at[0, :d_model].set(gamma.astype(jnp.float32))
    b2 = jnp.zeros((1, d_pad), jnp.float32).at[0, :d_model].set(beta.astype(jnp.float32))

    kernel = functools.partial(_layernorm_kernel, eps=eps, d_true=d_model)

    out = pl.pallas_call(
        kernel,
        out_shape=jax.ShapeDtypeStruct((rows_pad, d_pad), dtype),
        grid_spec=pltpu.PrefetchScalarGridSpec(
            num_scalar_prefetch=0,
            grid=(grid,),
            in_specs=[
                pl.BlockSpec((tile_rows, d_pad), lambda i: (i, 0)),
                pl.BlockSpec((1, d_pad), lambda i: (0, 0)),
                pl.BlockSpec((1, d_pad), lambda i: (0, 0)),
            ],
            out_specs=pl.BlockSpec((tile_rows, d_pad), lambda i: (i, 0)),
        ),
        compiler_params=pltpu.CompilerParams(
            dimension_semantics=("parallel",),
            vmem_limit_bytes=32 * 1024 * 1024,
        ),
    )(x2, g2, b2)

    if padded:
        out = out[:rows, :d_model]
    return out.reshape(orig_shape)


def _reference(x, gamma, beta, eps):
    mean = jnp.mean(x, axis=-1, keepdims=True)
    var = jnp.mean((x - mean) ** 2, axis=-1, keepdims=True)
    return gamma * ((x - mean) / jnp.sqrt(var + eps)) + beta


if __name__ == "__main__":
    key = jax.random.PRNGKey(0)
    eps = 1e-12

    # Case 1: shapes matching the module's usage (batch, seq, d_model).
    batch, seq, d_model = 2, 8, 32
    x = jax.random.normal(key, (batch, seq, d_model), dtype=jnp.float32)
    gamma = jnp.ones((d_model,), dtype=jnp.float32)   # torch.ones(d_model)
    beta = jnp.zeros((d_model,), dtype=jnp.float32)   # torch.zeros(d_model)

    out = jax.block_until_ready(layer_norm(x, gamma, beta, eps=eps))
    ref = _reference(x, gamma, beta, eps)
    assert jnp.allclose(out, ref, atol=1e-5, rtol=1e-5), "mismatch vs reference (case 1)"

    # Case 2: awkward sizes (rows not a multiple of the tile, d_model not a
    # multiple of 128, non-trivial gamma/beta) to exercise the padding path.
    k1, k2, k3 = jax.random.split(key, 3)
    x2 = jax.random.normal(k1, (3, 7, 200), dtype=jnp.float32)
    g2 = jax.random.normal(k2, (200,), dtype=jnp.float32)
    b2 = jax.random.normal(k3, (200,), dtype=jnp.float32)
    out2 = jax.block_until_ready(layer_norm(x2, g2, b2, eps=eps))
    ref2 = _reference(x2, g2, b2, eps)
    assert jnp.allclose(out2, ref2, atol=1e-4, rtol=1e-4), "mismatch vs reference (case 2)"

    print("KERNEL_OK")
</pallas_src>

<mosaic_0001>
module attributes {stable_mosaic.version = 11 : i64} {
  func.func @_layernorm_kernel(%arg0: i32, %arg1: memref<16x128xf32, #tpu.memory_space<vmem>>, %arg2: memref<1x128xf32, #tpu.memory_space<vmem>>, %arg3: memref<1x128xf32, #tpu.memory_space<vmem>>, %arg4: memref<16x128xf32, #tpu.memory_space<vmem>>) attributes {dimension_semantics = [#tpu.dimension_semantics<parallel>], iteration_bounds = array<i64: 1>, scalar_prefetch = 0 : i64, scratch_operands = 0 : i64, tpu.core_type = #tpu.core_type<tc>, window_params = [{transform_indices = @transform_0, window_bounds = array<i64: 16, 128>}, {pipeline_mode = #tpu.pipeline_mode<synchronous>, transform_indices = @transform_1, window_bounds = array<i64: 1, 128>}, {pipeline_mode = #tpu.pipeline_mode<synchronous>, transform_indices = @transform_2, window_bounds = array<i64: 1, 128>}, {transform_indices = @transform_3, window_bounds = array<i64: 16, 128>}]} {
    %c0 = arith.constant 0 : index
    %c0_0 = arith.constant 0 : index
    %0 = vector.load %arg1[%c0, %c0_0] : memref<16x128xf32, #tpu.memory_space<vmem>>, vector<16x128xf32>
    %cst = arith.constant dense<0.000000e+00> : vector<16xf32>
    %1 = vector.multi_reduction <add>, %0, %cst [1] : vector<16x128xf32> to vector<16xf32>
    %2 = vector.shape_cast %1 : vector<16xf32> to vector<16x1xf32>
    %3 = arith.mulf %0, %0 : vector<16x128xf32>
    %cst_1 = arith.constant dense<0.000000e+00> : vector<16xf32>
    %4 = vector.multi_reduction <add>, %3, %cst_1 [1] : vector<16x128xf32> to vector<16xf32>
    %5 = vector.shape_cast %4 : vector<16xf32> to vector<16x1xf32>
    %cst_2 = arith.constant 3.125000e-02 : f32
    %6 = vector.broadcast %cst_2 : f32 to vector<16x1xf32>
    %7 = arith.mulf %2, %6 : vector<16x1xf32>
    %cst_3 = arith.constant 3.125000e-02 : f32
    %8 = vector.broadcast %cst_3 : f32 to vector<16x1xf32>
    %9 = arith.mulf %5, %8 : vector<16x1xf32>
    %10 = arith.mulf %7, %7 : vector<16x1xf32>
    %11 = arith.subf %9, %10 : vector<16x1xf32>
    %cst_4 = arith.constant 0.000000e+00 : f32
    %12 = vector.broadcast %cst_4 : f32 to vector<16x1xf32>
    %13 = arith.maximumf %11, %12 : vector<16x1xf32>
    %cst_5 = arith.constant 9.99999996E-13 : f32
    %14 = vector.broadcast %cst_5 : f32 to vector<16x1xf32>
    %15 = arith.addf %13, %14 : vector<16x1xf32>
    %16 = math.rsqrt %15 : vector<16x1xf32>
    %17 = vector.broadcast %7 : vector<16x1xf32> to vector<16x128xf32>
    %18 = arith.subf %0, %17 : vector<16x128xf32>
    %19 = vector.broadcast %16 : vector<16x1xf32> to vector<16x128xf32>
    %20 = arith.mulf %18, %19 : vector<16x128xf32>
    %c0_6 = arith.constant 0 : index
    %c0_7 = arith.constant 0 : index
    %21 = vector.load %arg2[%c0_6, %c0_7] : memref<1x128xf32, #tpu.memory_space<vmem>>, vector<1x128xf32>
    %22 = vector.broadcast %21 : vector<1x128xf32> to vector<16x128xf32>
    %23 = arith.mulf %22, %20 : vector<16x128xf32>
    %c0_8 = arith.constant 0 : index
    %c0_9 = arith.constant 0 : index
    %24 = vector.load %arg3[%c0_8, %c0_9] : memref<1x128xf32, #tpu.memory_space<vmem>>, vector<1x128xf32>
    %25 = vector.broadcast %24 : vector<1x128xf32> to vector<16x128xf32>
    %26 = arith.addf %23, %25 : vector<16x128xf32>
    %c0_10 = arith.constant 0 : index
    %c0_11 = arith.constant 0 : index
    %27 = vector.load %arg4[%c0_10, %c0_11] : memref<16x128xf32, #tpu.memory_space<vmem>>, vector<16x128xf32>
    tpu.vector_store %arg4[%c0_10, %c0_11], %26 {strides = array<i32>} : memref<16x128xf32, #tpu.memory_space<vmem>>, vector<16x128xf32>,
    return
  }
  func.func @transform_0(%arg0: i32) -> (i32, i32) {
    %c0_i32 = arith.constant 0 : i32
    %c0_i32_0 = arith.constant 0 : i32
    return %arg0, %c0_i32 : i32, i32
  }
  func.func @transform_1(%arg0: i32) -> (i32, i32) {
    %c0_i32 = arith.constant 0 : i32
    %c0_i32_0 = arith.constant 0 : i32
    %c0_i32_1 = arith.constant 0 : i32
    return %c0_i32, %c0_i32_0 : i32, i32
  }
  func.func @transform_2(%arg0: i32) -> (i32, i32) {
    %c0_i32 = arith.constant 0 : i32
    %c0_i32_0 = arith.constant 0 : i32
    %c0_i32_1 = arith.constant 0 : i32
    return %c0_i32, %c0_i32_0 : i32, i32
  }
  func.func @transform_3(%arg0: i32) -> (i32, i32) {
    %c0_i32 = arith.constant 0 : i32
    %c0_i32_0 = arith.constant 0 : i32
    return %arg0, %c0_i32 : i32, i32
  }
}

</mosaic_0001>

<bundles_post_ra>
// kernel: tpu_custom_call.1
= control target key start
LH: loop header
LB: loop body
LE: loop exit
PB: predicated region body
PF: predicated region fallthrough
CT: control target
= control target key end

     0   :  { %8 = vsyncpa [#allocation3], 0  ;;  %s214_s0 = inlined_call_operand.hbm [shape: f32[16,128], index: 0, kind: input, shape index: {}]   ;;  %s215_s1 = inlined_call_operand.vmem [shape: f32[1,128], index: 1, kind: input, shape index: {}]   ;;  %s216_s2 = inlined_call_operand.vmem [shape: f32[1,128], index: 2, kind: input, shape index: {}]   ;;  %s217_s3 = inlined_call_operand.hbm [shape: f32[16,128], index: 3, kind: output, shape index: {}]  }
   0x1   :  { %9 = vsyncpa [#allocation4], 0  ;;  %s154_s12 = smov [#allocation2]   ;;  %s106_s16 = scalar_lea.hbm %s214_s0, 256 }
   0x2   :  { %s15_s13 = sshll.u32 %s154_s12, 4  ;;  %p107_p0 = scmp.ne.s32.totalorder %s214_s0, %s106_s16  ;;  %s16_s13 = int_to_ptr.vmem [resolvable:$true] %s15_s13 }
   0x3   :  { %p110_p1 = scmp.lt.u32.totalorder %s106_s16, %s214_s0 }
   0x5   :  { %p112_p2 = pnand %p110_p1, %p107_p0 }
   0x7   :  { %115 = shalt.err (!%p112_p2)
}
   0x8   :  { %s116_s21 = scalar_lea.vmem %s16_s13, 256  ;;  %p121_p4 = scmp.lt.s32.totalorder %s16_s13, %s16_s13 }
   0x9   :  { %p117_p3 = scmp.ne.s32.totalorder %s16_s13, %s116_s21  ;;  %p122_p5 = scmp.lt.s32.totalorder %s116_s21, %s116_s21 }
   0xb   :  { %p123_p6 = por %p122_p5, %p121_p4 }
   0xd   :  { %p124_p7 = pnand %p123_p6, %p117_p3 }
   0xf   :  { %127 = shalt.err (!%p124_p7)
}
  0x10   :  { %s155_s22 = smov 128   ;;  %s156_s23 = smov 8  }
  0x11   :  { %21 = dma.hbm_to_vmem [thread:$0]  %s214_s0, 256, %s16_s13, [#allocation3], %s155_s22, %s155_s22, %s156_s23  }
  0x12   :  { %150 = dma.done.wait [#allocation3], 256  }
  0x13   :  { %151 = vsyncadd [#allocation3], 4294967040  ;;  %v29_v0 = vld [vmem:[#allocation2] sm:$0xff]  ;;  %v30_v1 = vld [vmem:[#allocation2 + $0x8] sm:$0xff]  ;;  %s157_s29 = smov [#allocation5]  }
  0x14   :  { %31 = vadd.xlane.f32.xlu0 %v29_v0  ;;  %v35_v2 = vmul.f32 %v29_v0, %v29_v0  ;;  %v36_v3 = vmul.f32 %v30_v1, %v30_v1  ;;  %v96_v22 = vld [vmem:[%s215_s1] ss:$0 sm:$0xff]  ;;  %s84_s30 = sshll.u32 %s157_s29, 4  ;;  %s85_s30 = int_to_ptr.vmem [resolvable:$true] %s84_s30 }
  0x15   :  { %v97_v24 = vld [vmem:[%s216_s2] ss:$0 sm:$0xff]  ;;  %s128_s4 = scalar_lea.vmem %s85_s30, 256  ;;  %p133_p9 = scmp.lt.s32.totalorder %s85_s30, %s85_s30 }
  0x16   :  { %37 = vadd.xlane.f32.xlu1 %v35_v2  ;;  %p129_p8 = scmp.ne.s32.totalorder %s85_s30, %s128_s4  ;;  %p134_p10 = scmp.lt.s32.totalorder %s128_s4, %s128_s4 }
  0x18   :  { %33 = vadd.xlane.f32.xlu0 %v30_v1  ;;  %p135_p11 = por %p134_p10, %p133_p9 }
  0x1a   :  { %39 = vadd.xlane.f32.xlu1 %v36_v3  ;;  %p136_p12 = pnand %p135_p11, %p129_p8 }
  0xa1   :  { %v32_v4 = vpop.xlane.xlu0 %31 }
  0xa2   :  { %v41_v5 = vmul.f32 0.03125, %v32_v4 }
  0xa3   :  { %v38_v6 = vpop.xlane.xlu1 %37 }
  0xa4   :  { %v45_v7 = vmul.f32 %v41_v5, %v41_v5  ;;  %v43_v8 = vmul.f32 0.03125, %v38_v6  ;;  %v55_v20 = vsub.f32 %v29_v0, %v41_v5 }
  0xa5   :  { %v34_v9 = vpop.xlane.xlu0 %33 }
  0xa6   :  { %v47_v10 = vsub.f32 %v43_v8, %v45_v7  ;;  %v42_v11 = vmul.f32 0.03125, %v34_v9 }
  0xa7   :  { %v40_v12 = vpop.xlane.xlu1 %39 }
  0xa8   :  { %v49_v13 = vmax.f32 %v47_v10, 0.0  ;;  %v46_v14 = vmul.f32 %v42_v11, %v42_v11  ;;  %v44_v15 = vmul.f32 0.03125, %v40_v12  ;;  %v56_v25 = vsub.f32 %v30_v1, %v42_v11 }
  0xaa   :  { %v51_v16 = vadd.f32 1e-12, %v49_v13  ;;  %v48_v17 = vsub.f32 %v44_v15, %v46_v14 }
  0xac   :  { %102 = vrsqrt.f32 %v51_v16  ;;  %v50_v18 = vmax.f32 %v48_v17, 0.0 }
  0xae   :  { %v52_v19 = vadd.f32 1e-12, %v50_v18 }
  0xb0   :  { %104 = vrsqrt.f32 %v52_v19 }
  0xb6   :  { %v103_v21 = vpop.eup %102 }
  0xb7   :  { %v57_v23 = vmul.f32 %v103_v21, %v55_v20 }
  0xb9   :  { %v66_v26 = vmul.f32 %v96_v22, %v57_v23 }
  0xba   :  { %v105_v27 = vpop.eup %104 }
  0xbb   :  { %v58_v28 = vmul.f32 %v105_v27, %v56_v25  ;;  %v75_v29 = vadd.f32 %v97_v24, %v66_v26 }
  0xbd   :  { %v67_v30 = vmul.f32 %v96_v22, %v58_v28  ;;  %77 = vst [vmem:[#allocation5] sm:$0xff] %v75_v29 }
  0xbf   :  { %v76_v31 = vadd.f32 %v97_v24, %v67_v30 }
  0xc1   :  { %78 = vst [vmem:[#allocation5 + $0x8] sm:$0xff] %v76_v31 }
  0xc2   :  { %139 = shalt.err (!%p136_p12)
}
  0xc3   :  { %s140_s5 = scalar_lea.hbm %s217_s3, 256 }
  0xc4   :  { %p141_p13 = scmp.ne.s32.totalorder %s217_s3, %s140_s5  ;;  %p144_p0 = scmp.lt.u32.totalorder %s140_s5, %s217_s3 }
  0xc6   :  { %p146_p1 = pnand %p144_p0, %p141_p13 }
  0xc8   :  { %149 = shalt.err (!%p146_p1)
}
  0xc9   :  { %90 = dma.vmem_to_hbm [thread:$0]  %s85_s30, 256, %s217_s3, [#allocation4], %s155_s22, %s155_s22, %s156_s23  }
  0xca   :  { %152 = dma.done.wait [#allocation4], 256  }
  0xcb   :  { %153 = vsyncadd [#allocation4], 4294967040 }
  0xcc   :  { %94 = vsyncpa [#allocation3], 1 }
  0xcd   :  { %95 = vsyncpa [#allocation4], 1 }

</bundles_post_ra>
